<compile_context>
chip_gen: v6e
topology: v6e:2x2x1
jax: 0.10.0
libtpu: 0.0.40
codegen_flags: <defaults>
</compile_context>

<pallas_src>
import jax
import jax.numpy as jnp
from jax.experimental import pallas as pl
from jax.experimental.pallas import tpu as pltpu

IN_FEATURES = 512
NUM_ACTIONS = 10
A_PAD = 128          # lane-dense padded action dimension (keep at 128, HBM-bound)
DEFAULT_TB = 4096    # max batch tile (rows of f32 x); ~20 MiB double-buffered


def _round_up(n, m):
    return ((n + m - 1) // m) * m


def linear_kernel(x_ref, w_ref, b_ref, o_ref):
    # x_ref: [TB, 512] f32   w_ref: [512, 128] bf16
    # b_ref: [1, 128]  f32   o_ref: [TB, 128]  f32
    x_bf16 = x_ref[...].astype(jnp.bfloat16)          # in-kernel cast (free under DMA slack)
    acc = jnp.dot(x_bf16, w_ref[...], preferred_element_type=jnp.float32)
    o_ref[...] = acc + b_ref[...]


def prepare_params(w, b):
    """Torch-layout params (w: [A, 512] f32, b: [A] f32) -> kernel layout:
    w_pad [512, 128] bf16 (pre-transposed, lane zero-padded), b_pad [1, 128] f32.
    Done once at init, not per forward."""
    A = w.shape[0]
    w_pad = jnp.zeros((IN_FEATURES, A_PAD), jnp.float32)
    w_pad = w_pad.at[:, :A].set(w.T).astype(jnp.bfloat16)
    b_pad = jnp.zeros((1, A_PAD), jnp.float32).at[0, :A].set(b)
    return w_pad, b_pad


def action_classification_forward(x, w_pad, b_pad, num_actions=NUM_ACTIONS,
                                  *, block_b=DEFAULT_TB, return_padded=False):
    """x: [B, 512] f32.  w_pad: [512, 128] bf16.  b_pad: [1, 128] f32.
    Returns [B, num_actions] f32 == x @ W.T + b  (or [B, 128] if return_padded)."""
    B = x.shape[0]

    # Batch tile: a multiple of 8 sublanes, at most block_b rows, and at least
    # two tiles whenever B has >= 16 rows (so v7x's 2 TCs both get work).
    # No jnp.pad — Pallas pads the ragged last block's reads and masks its writes.
    tb = min(block_b, max(8, _round_up(pl.cdiv(B, 2), 8)))
    n_tiles = pl.cdiv(B, tb)

    bytes_accessed = (x.size * x.dtype.itemsize      # f32 activations read (single pass)
                      + w_pad.size * 2               # bf16 weight read
                      + b_pad.size * 4               # f32 bias read
                      + B * A_PAD * 4)               # f32 output written

    out = pl.pallas_call(
        linear_kernel,
        out_shape=jax.ShapeDtypeStruct((B, A_PAD), jnp.float32),
        grid=(n_tiles,),
        in_specs=[
            pl.BlockSpec((tb, IN_FEATURES), lambda i: (i, 0)),     # x: tiled over batch
            pl.BlockSpec((IN_FEATURES, A_PAD), lambda i: (0, 0)),  # weight: resident
            pl.BlockSpec((1, A_PAD), lambda i: (0, 0)),            # bias: resident
        ],
        out_specs=pl.BlockSpec((tb, A_PAD), lambda i: (i, 0)),
        compiler_params=pltpu.CompilerParams(
            dimension_semantics=("parallel",),      # shard batch tiles across TCs (v7x)
            vmem_limit_bytes=32 * 1024 * 1024,      # safe on all gens (v7x phys 64 MiB)
        ),
        cost_estimate=pl.CostEstimate(
            flops=2 * B * IN_FEATURES * A_PAD,
            transcendentals=0,
            bytes_accessed=bytes_accessed,
        ),
    )(x, w_pad, b_pad)

    if return_padded:
        return out          # [B, 128]; lanes >= num_actions are exact bias copies
    return out[:, :num_actions]


def init_params(key, num_actions=NUM_ACTIONS):
    # Deterministic init mimicking nn.Linear's uniform(-1/sqrt(fan_in), +1/sqrt(fan_in)).
    kw, kb = jax.random.split(key)
    bound = 1.0 / jnp.sqrt(jnp.float32(IN_FEATURES))
    w = jax.random.uniform(kw, (num_actions, IN_FEATURES), jnp.float32, -bound, bound)
    b = jax.random.uniform(kb, (num_actions,), jnp.float32, -bound, bound)
    return w, b


if __name__ == "__main__":
    key = jax.random.PRNGKey(0)
    k_x, k_x2, k_p = jax.random.split(key, 3)

    w, b = init_params(k_p, NUM_ACTIONS)       # torch layout: w [10, 512], b [10]
    w_pad, b_pad = prepare_params(w, b)        # kernel layout (done once)

    def check(x):
        out = jax.block_until_ready(
            action_classification_forward(x, w_pad, b_pad, NUM_ACTIONS))
        assert out.shape == (x.shape[0], NUM_ACTIONS)
        # Tight check against a bf16-input / f32-accumulate reference
        # (matches what the MXU computes).
        xq = x.astype(jnp.bfloat16).astype(jnp.float32)
        wq = w.T.astype(jnp.bfloat16).astype(jnp.float32)
        ref_bf16 = xq @ wq + b
        assert jnp.allclose(out, ref_bf16, atol=1e-3, rtol=1e-3)
        # Loose check against the full-f32 torch-equivalent math.
        ref_f32 = x @ w.T + b
        assert jnp.allclose(out, ref_f32, atol=5e-2, rtol=5e-2)

    # Small shape consistent with the module (batch=2, features=512).
    x_small = jax.random.normal(k_x, (2, IN_FEATURES), jnp.float32)
    check(x_small)

    # Also exercise the multi-tile path with a ragged final block (300 % 8 != 0,
    # two tiles of 152 rows -> last 4 rows of the final block are masked).
    x_mid = jax.random.normal(k_x2, (300, IN_FEATURES), jnp.float32)
    check(x_mid)

    print("KERNEL_OK")
</pallas_src>

<mosaic_0001>
module attributes {stable_mosaic.version = 11 : i64} {
  func.func @linear_kernel(%arg0: i32, %arg1: memref<8x512xf32, #tpu.memory_space<vmem>>, %arg2: memref<512x128xbf16, #tpu.memory_space<vmem>>, %arg3: memref<1x128xf32, #tpu.memory_space<vmem>>, %arg4: memref<8x128xf32, #tpu.memory_space<vmem>>) attributes {dimension_semantics = [#tpu.dimension_semantics<parallel>], iteration_bounds = array<i64: 1>, scalar_prefetch = 0 : i64, scratch_operands = 0 : i64, tpu.core_type = #tpu.core_type<tc>, window_params = [{transform_indices = @transform_0, window_bounds = array<i64: 8, 512>}, {pipeline_mode = #tpu.pipeline_mode<synchronous>, transform_indices = @transform_1, window_bounds = array<i64: 512, 128>}, {pipeline_mode = #tpu.pipeline_mode<synchronous>, transform_indices = @transform_2, window_bounds = array<i64: 1, 128>}, {transform_indices = @transform_3, window_bounds = array<i64: 8, 128>}]} {
    %c0 = arith.constant 0 : index
    %c0_0 = arith.constant 0 : index
    %0 = vector.load %arg1[%c0, %c0_0] : memref<8x512xf32, #tpu.memory_space<vmem>>, vector<8x512xf32>
    %1 = arith.truncf %0 : vector<8x512xf32> to vector<8x512xbf16>
    %c0_1 = arith.constant 0 : index
    %c0_2 = arith.constant 0 : index
    %2 = vector.load %arg2[%c0_1, %c0_2] : memref<512x128xbf16, #tpu.memory_space<vmem>>, vector<512x128xbf16>
    %cst = arith.constant dense<0.000000e+00> : vector<8x128xf32>
    %3 = tpu.matmul %1, %2, %cst {dimension_numbers = #tpu.dot_dimension_numbers<[1], [0], [0], [1], [0, 0, 1, 1], [], []>} : vector<8x512xbf16>, vector<512x128xbf16>, vector<8x128xf32> -> vector<8x128xf32>
    %c0_3 = arith.constant 0 : index
    %c0_4 = arith.constant 0 : index
    %4 = vector.load %arg3[%c0_3, %c0_4] : memref<1x128xf32, #tpu.memory_space<vmem>>, vector<1x128xf32>
    %5 = vector.broadcast %4 : vector<1x128xf32> to vector<8x128xf32>
    %6 = arith.addf %3, %5 : vector<8x128xf32>
    %c0_5 = arith.constant 0 : index
    %c0_6 = arith.constant 0 : index
    %7 = vector.load %arg4[%c0_5, %c0_6] : memref<8x128xf32, #tpu.memory_space<vmem>>, vector<8x128xf32>
    tpu.vector_store %arg4[%c0_5, %c0_6], %6 {strides = array<i32>} : memref<8x128xf32, #tpu.memory_space<vmem>>, vector<8x128xf32>,
    return
  }
  func.func @transform_0(%arg0: i32) -> (i32, i32) {
    %c0_i32 = arith.constant 0 : i32
    %c0_i32_0 = arith.constant 0 : i32
    return %arg0, %c0_i32 : i32, i32
  }
  func.func @transform_1(%arg0: i32) -> (i32, i32) {
    %c0_i32 = arith.constant 0 : i32
    %c0_i32_0 = arith.constant 0 : i32
    %c0_i32_1 = arith.constant 0 : i32
    return %c0_i32, %c0_i32_0 : i32, i32
  }
  func.func @transform_2(%arg0: i32) -> (i32, i32) {
    %c0_i32 = arith.constant 0 : i32
    %c0_i32_0 = arith.constant 0 : i32
    %c0_i32_1 = arith.constant 0 : i32
    return %c0_i32, %c0_i32_0 : i32, i32
  }
  func.func @transform_3(%arg0: i32) -> (i32, i32) {
    %c0_i32 = arith.constant 0 : i32
    %c0_i32_0 = arith.constant 0 : i32
    return %arg0, %c0_i32 : i32, i32
  }
}

</mosaic_0001>

<bundles_post_ra>
// kernel: tpu_custom_call.1
= control target key start
LH: loop header
LB: loop body
LE: loop exit
PB: predicated region body
PF: predicated region fallthrough
CT: control target
= control target key end

     0   :  { %8 = vsyncpa [#allocation3], 0  ;;  %s691_s0 = inlined_call_operand.hbm [shape: f32[2,512], index: 0, kind: input, shape index: {}]   ;;  %s692_s1 = inlined_call_operand.hbm [shape: bf16[512,128], index: 1, kind: input, shape index: {}]   ;;  %s693_s2 = inlined_call_operand.vmem [shape: f32[1,128], index: 2, kind: input, shape index: {}]   ;;  %s694_s3 = inlined_call_operand.hbm [shape: f32[2,128], index: 3, kind: output, shape index: {}]  }
   0x1   :  { %9 = vsyncpa [#allocation6], 0 }
   0x2   :  { %10 = vsyncpa [#allocation4], 0 }
   0x3   :  { %15 = vsyncadd [#allocation3], 384  ;;  %s649_s12 = smov [#allocation2]  }
   0x4   :  { %s16_s13 = sshll.u32 %s649_s12, 4  ;;  %s17_s13 = int_to_ptr.vmem [resolvable:$true] %s16_s13 }
   0x5   :  { %s591_s14 = scalar_lea.vmem %s17_s13, 128  ;;  %s595_s15 = scalar_lea.vmem %s17_s13, 512 }
   0x6   :  { %p592_p0 = scmp.ne.s32.totalorder %s17_s13, %s591_s14  ;;  %p596_p1 = scmp.lt.s32.totalorder %s17_s13, %s17_s13 }
   0x7   :  { %p597_p2 = scmp.lt.s32.totalorder %s595_s15, %s591_s14 }
   0x9   :  { %p598_p3 = por %p597_p2, %p596_p1 }
   0xb   :  { %p599_p4 = pnand %p598_p3, %p592_p0 }
   0xd   :  { %602 = shalt.err (!%p599_p4)
}
   0xe   :  { %s650_s16 = smov 128   ;;  %s651_s17 = smov 8  }
   0xf   :  { %22 = dma.hbm_to_vmem [thread:$0]  %s691_s0, 128, %s17_s13, [#allocation3], %s650_s16, %s650_s16, %s651_s17  }
  0x10   :  { %s652_s20 = smov [#allocation5]  }
  0x11   :  { %s28_s21 = sshll.u32 %s652_s20, 4  ;;  %s29_s21 = int_to_ptr.vmem [resolvable:$true] %s28_s21 }
  0x12   :  { %s611_s22 = scalar_lea.vmem %s29_s21, 4096  ;;  %p616_p6 = scmp.lt.s32.totalorder %s29_s21, %s29_s21 }
  0x13   :  { %p612_p5 = scmp.ne.s32.totalorder %s29_s21, %s611_s22  ;;  %p617_p7 = scmp.lt.s32.totalorder %s611_s22, %s611_s22 }
  0x15   :  { %p618_p8 = por %p617_p7, %p616_p6 }
  0x17   :  { %p619_p9 = pnand %p618_p8, %p612_p5 }
  0x19   :  { %622 = shalt.err (!%p619_p9)
}
  0x1a   :  { %s653_s23 = smov 64   ;;  %s654_s24 = smov 4  }
  0x1b   :  { %34 = dma.hbm_to_vmem [thread:$0]  %s692_s1, 4096, %s29_s21, [#allocation6], %s653_s23, %s653_s23, %s654_s24  }
  0x1c   :  { %643 = dma.done.wait [#allocation3], 512  }
  0x1d   :  { %644 = vsyncadd [#allocation3], 4294966784 }
  0x1e   :  { %645 = dma.done.wait [#allocation6], 4096  }
  0x1f   :  { %646 = vsyncadd [#allocation6], 4294963200  ;;  %v545_v0 = vld [vmem:[#allocation5 + $0x78] sm:$0xff]   ;;  %v549_v4 = vld [vmem:[#allocation5 + $0x70] sm:$0xff]   ;;  %v655_v24 = vmov 1983009808   ;;  %v59_v26 = vlaneseq }
  0x20   :  { %v546_v1 = vld [vmem:[#allocation5 + $0xf8] sm:$0xff]   ;;  %491 = vmatprep.subr.bf16.mxu0 %v545_v0  ;;  %v550_v5 = vld [vmem:[#allocation5 + $0xf0] sm:$0xff]   ;;  %v553_v8 = vld [vmem:[#allocation5 + $0x68] sm:$0xff]   ;;  %v57_v25 = vunpack.c.l.s4 %v655_v24 }
  0x21   :  { %v547_v2 = vld [vmem:[#allocation5 + $0x38] sm:$0xff]   ;;  %513 = vmatprep.subr.bf16.mxu1 %v546_v1  ;;  %v551_v6 = vld [vmem:[#allocation5 + $0x30] sm:$0xff]   ;;  %v554_v9 = vld [vmem:[#allocation5 + $0xe8] sm:$0xff]   ;;  %v60_v32 = vshrl.u32 %v59_v26, 7 }
  0x22   :  { %v548_v3 = vld [vmem:[#allocation5 + $0xb8] sm:$0xff]   ;;  %492 = vmatpush3.bf16.msra.mxu0 %v547_v2  ;;  %v552_v7 = vld [vmem:[#allocation5 + $0xb0] sm:$0xff]   ;;  %v555_v10 = vld [vmem:[#allocation5 + $0x28] sm:$0xff]   ;;  %v58_v31 = vunpack.c.0.s8 %v57_v25 }
  0x23   :  { %514 = vmatpush3.bf16.msra.mxu1 %v548_v3  ;;  %493 = vmatprep.subr.bf16.mxu0 %v549_v4  ;;  %v556_v11 = vld [vmem:[#allocation5 + $0xa8] sm:$0xff]   ;;  %v557_v12 = vld [vmem:[#allocation5 + $0x60] sm:$0xff]   ;;  %v561_v16 = vld [vmem:[#allocation5 + $0x58] sm:$0xff]  }
  0x24   :  { %515 = vmatprep.subr.bf16.mxu1 %v550_v5  ;;  %v558_v13 = vld [vmem:[#allocation5 + $0xe0] sm:$0xff]   ;;  %v562_v17 = vld [vmem:[#allocation5 + $0xd8] sm:$0xff]   ;;  %v565_v20 = vld [vmem:[#allocation5 + $0x50] sm:$0xff]   ;;  %v61_v37 = vsub.s32 %v58_v31, %v60_v32 }
  0x25   :  { %v559_v14 = vld [vmem:[#allocation5 + $0x20] sm:$0xff]   ;;  %v563_v18 = vld [vmem:[#allocation5 + $0x18] sm:$0xff]   ;;  %v566_v21 = vld [vmem:[#allocation5 + $0xd0] sm:$0xff]  }
  0x26   :  { %494 = vmatpush3.bf16.msra.mxu0 %v551_v6  ;;  %v560_v15 = vld [vmem:[#allocation5 + $0xa0] sm:$0xff]   ;;  %v564_v19 = vld [vmem:[#allocation5 + $0x98] sm:$0xff]   ;;  %v567_v22 = vld [vmem:[#allocation5 + $0x10] sm:$0xff]  }
  0x27   :  { %516 = vmatpush3.bf16.msra.mxu1 %v552_v7  ;;  %495 = vmatprep.subr.bf16.mxu0 %v553_v8  ;;  %v568_v23 = vld [vmem:[#allocation5 + $0x90] sm:$0xff]   ;;  %v569_v27 = vld [vmem:[#allocation5 + $0x48] sm:$0xff]   ;;  %v573_v33 = vld [vmem:[#allocation5 + $0x40] sm:$0xff]  }
  0x28   :  { %517 = vmatprep.subr.bf16.mxu1 %v554_v9  ;;  %v570_v28 = vld [vmem:[#allocation5 + $0xc8] sm:$0xff]   ;;  %v574_v34 = vld [vmem:[#allocation5 + $0xc0] sm:$0xff]   ;;  %v579_v39 = vld [vmem:[#allocation2 + $0x10] ss:$8 sps:$4 sm:$0xff]  }
  0x29   :  { %v571_v29 = vld [vmem:[#allocation5 + $0x8] sm:$0xff]   ;;  %v575_v35 = vld [vmem:[#allocation5] sm:$0xff]   ;;  %v582_v41 = vld [vmem:[#allocation2 + $0x14] ss:$8 sps:$4 sm:$0xff]   ;;  %v76_v43 = vrot.slane %v579_v39, %v61_v37 }
  0x2a   :  { %496 = vmatpush3.bf16.msra.mxu0 %v555_v10  ;;  %v572_v30 = vld [vmem:[#allocation5 + $0x88] sm:$0xff]   ;;  %v576_v36 = vld [vmem:[#allocation5 + $0x80] sm:$0xff]   ;;  %v83_v45 = vrot.slane %v582_v41, %v61_v37 }
  0x2b   :  { %518 = vmatpush3.bf16.msra.mxu1 %v556_v11  ;;  %497 = vmatprep.subr.bf16.mxu0 %v557_v12  ;;  %v577_v38 = vld [vmem:[#allocation2] ss:$8 sps:$4 sm:$0xff]   ;;  %v581_v40 = vld [vmem:[#allocation2 + $0x4] ss:$8 sps:$4 sm:$0xff]  }
  0x2c   :  { %519 = vmatprep.subr.bf16.mxu1 %v558_v13  ;;  %v62_v42 = vrot.slane %v577_v38, %v61_v37  ;;  %v69_v44 = vrot.slane %v581_v40, %v61_v37  ;;  %v458_v56 = vld [vmem:[%s693_s2] ss:$0 sm:$0xff] }
  0x2e   :  { %498 = vmatpush3.bf16.msra.mxu0 %v559_v14  ;;  %v85_v46 = vcombine.high %v62_v42, %v76_v43  ;;  %v84_v47 = vcombine.low %v62_v42, %v76_v43  ;;  %v87_v48 = vcombine.high %v69_v44, %v83_v45  ;;  %v86_v49 = vcombine.low %v69_v44, %v83_v45 }
  0x2f   :  { %520 = vmatpush3.bf16.msra.mxu1 %v560_v15  ;;  %499 = vmatprep.subr.bf16.mxu0 %v561_v16 }
  0x30   :  { %521 = vmatprep.subr.bf16.mxu1 %v562_v17  ;;  %v93_v50 = vpack.c.bf16 %v85_v46, %v85_v46  ;;  %v92_v51 = vpack.c.bf16 %v84_v47, %v84_v47  ;;  %v95_v52 = vpack.c.bf16 %v87_v48, %v87_v48  ;;  %v94_v53 = vpack.c.bf16 %v86_v49, %v86_v49 }
  0x32   :  { %500 = vmatpush3.bf16.msra.mxu0 %v563_v18  ;;  %391 = vmatprep.mubr.bf16.mxu0 %v93_v50 }
  0x33   :  { %522 = vmatpush3.bf16.msra.mxu1 %v564_v19  ;;  %501 = vmatprep.subr.bf16.mxu0 %v565_v20 }
  0x34   :  { %523 = vmatprep.subr.bf16.mxu1 %v566_v21  ;;  %431 = vmatprep.mubr.bf16.mxu1 %v95_v52 }
  0x36   :  { %502 = vmatpush3.bf16.msra.mxu0 %v567_v22 }
  0x37   :  { %524 = vmatpush3.bf16.msra.mxu1 %v568_v23  ;;  %503 = vmatprep.subr.bf16.mxu0 %v569_v27 }
  0x38   :  { %525 = vmatprep.subr.bf16.mxu1 %v570_v28 }
  0x3a   :  { %504 = vmatpush3.bf16.msra.mxu0 %v571_v29 }
  0x3b   :  { %526 = vmatpush3.bf16.msra.mxu1 %v572_v30  ;;  %505 = vmatprep.subr.bf16.mxu0 %v573_v33 }
  0x3c   :  { %527 = vmatprep.subr.bf16.mxu1 %v574_v34 }
  0x3e   :  { %506 = vmatpush3.bf16.msra.mxu0 %v575_v35 }
  0x3f   :  { %528 = vmatpush3.bf16.msra.mxu1 %v576_v36 }
  0x41   :  { %392 = vmatmul.mubr.bf16.vlgmr.msra.gmra.mxu0 %v92_v51 }
  0x42   :  { %432 = vmatmul.mubr.bf16.vlgmr.msra.gmra.mxu1 %v94_v53 }
 0x101   :  { %v507_v54 = vpop.f32.mrf.mxu0 }
 0x102   :  { %v529_v55 = vpop.f32.mrf.mxu1 }
 0x103   :  { %v508_v57 = vpop.f32.mrf.mxu0 }
 0x104   :  { %v509_v58 = vadd.f32 %v508_v57, %v507_v54  ;;  %v530_v59 = vpop.f32.mrf.mxu1 }
 0x105   :  { %v510_v60 = vpop.f32.mrf.mxu0  ;;  %v531_v62 = vadd.f32 %v530_v59, %v529_v55 }
 0x106   :  { %v394_v61 = vadd.f32 %v509_v58, %v458_v56  ;;  %v532_v63 = vpop.f32.mrf.mxu1 }
 0x107   :  { %v511_v0 = vpop.f32.mrf.mxu0 }
 0x108   :  { %v434_v1 = vadd.f32 %v531_v62, %v394_v61  ;;  %v533_v2 = vpop.f32.mrf.mxu1 }
 0x10a   :  { %439 = vst [vmem:[#allocation7] sm:$0xff] %v434_v1 }
 0x10b   :  { %444 = vsyncadd [#allocation4], 96  ;;  %s656_s27 = smov [#allocation7]  }
 0x10c   :  { %s445_s28 = sshll.u32 %s656_s27, 4  ;;  %s446_s28 = int_to_ptr.vmem [resolvable:$true] %s445_s28 }
 0x10d   :  { %s623_s29 = scalar_lea.vmem %s446_s28, 32  ;;  %s627_s30 = scalar_lea.vmem %s446_s28, 128 }
 0x10e   :  { %p624_p10 = scmp.ne.s32.totalorder %s446_s28, %s623_s29  ;;  %p628_p11 = scmp.lt.s32.totalorder %s446_s28, %s446_s28 }
 0x10f   :  { %p629_p12 = scmp.lt.s32.totalorder %s627_s30, %s623_s29 }
 0x111   :  { %p630_p13 = por %p629_p12, %p628_p11 }
 0x113   :  { %p631_p0 = pnand %p630_p13, %p624_p10 }
 0x115   :  { %634 = shalt.err (!%p631_p0)
}
 0x116   :  { %s657_s2 = smov 32   ;;  %s658_s4 = smov 2  }
 0x117   :  { %451 = dma.vmem_to_hbm [thread:$0]  %s446_s28, 32, %s694_s3, [#allocation4], %s657_s2, %s657_s2, %s658_s4  }
 0x118   :  { %647 = dma.done.wait [#allocation4], 128  }
 0x119   :  { %648 = vsyncadd [#allocation4], 4294967168 }
 0x11a   :  { %455 = vsyncpa [#allocation3], 1 }
 0x11b   :  { %456 = vsyncpa [#allocation6], 1 }
 0x11c   :  { %457 = vsyncpa [#allocation4], 1 }

</bundles_post_ra>
